<compile_context>
chip_gen: v7x
topology: tpu7x:2x2x1
jax: 0.10.0
libtpu: 0.0.40
codegen_flags: <defaults>
</compile_context>

<pallas_src>
import jax
import jax.numpy as jnp
from jax.experimental import pallas as pl
from jax.experimental.pallas import tpu as pltpu

EPS = 1e-12  # F.normalize default eps


def rmsnorm_kernel(x_ref, g_ref, o_ref):
    # x_ref: (C, TL) block for one batch element / one L tile (batch squeezed)
    # g_ref: (C, 1) gain, already pre-scaled by sqrt(C)
    x = x_ref[...].astype(jnp.float32)
    g = g_ref[...].astype(jnp.float32)

    # L2 norm over the channel (sublane) axis, per (batch, position).
    sq_sum = jnp.sum(x * x, axis=0, keepdims=True)           # (1, TL)
    # 1 / max(sqrt(s), eps) == rsqrt(max(s, eps^2))  (algebraically identical
    # to F.normalize's clamp-then-divide). EUP rsqrt, off the VALU slot.
    inv = jax.lax.rsqrt(jnp.maximum(sq_sum, EPS * EPS))
    o_ref[...] = (x * inv * g).astype(o_ref.dtype)


def _vmem_capacity_bytes():
    """Physical per-core VMEM; conservative v7x default if query fails."""
    try:
        cap = getattr(pltpu.get_tpu_info(), "vmem_capacity_bytes", None)
        if cap:
            return int(cap)
    except Exception:
        pass
    return 64 << 20


def _pick_tl(B, L, C, itemsize, vmem_capacity):
    """Lane-dense (multiple-of-128) L tile.

    Sized for ~4 MiB of in+out traffic per grid step, bounded by a chip-aware
    VMEM budget for the double-buffered blocks, then shrunk (if possible) so
    the grid has at least 4 steps (2 per TensorCore)."""
    assert L >= 128
    per_lane = 2 * C * itemsize                      # in + out block bytes per lane
    target = 4 << 20                                 # bytes per grid step
    tl_target = max(128, (target // per_lane) // 128 * 128)
    budget = min(vmem_capacity // 3, 48 << 20)       # double-buffer budget
    tl_budget = max(128, (budget // (2 * per_lane)) // 128 * 128)
    tl = min(tl_target, tl_budget, (L // 128) * 128)
    # Keep the pipeline and both TensorCores busy for small-batch shapes.
    while tl > 128 and B * pl.cdiv(L, tl) < 4:
        tl = max(128, ((tl // 2) // 128) * 128)
    return int(tl)


def rmsnorm(x, g):
    """x: (B, C, L), g: (1, C, 1) -> (B, C, L), same dtype as x."""
    B, C, L = x.shape
    assert g.shape == (1, C, 1)

    # Fold the constant sqrt(C) into the (tiny) gain once, outside the kernel.
    g_scaled = g.astype(jnp.float32) * (C ** 0.5)

    if L < 128:
        # Tiny tensors: lane-masked stores + fixed pallas_call overhead would
        # dominate; let XLA fuse it instead.
        x32 = x.astype(jnp.float32)
        norm = jnp.maximum(jnp.sqrt(jnp.sum(x32 * x32, axis=1, keepdims=True)), EPS)
        return ((x32 / norm) * g_scaled).astype(x.dtype)

    itemsize = x.dtype.itemsize
    vmem_capacity = _vmem_capacity_bytes()
    TL = _pick_tl(B, L, C, itemsize, vmem_capacity)
    grid = (B, pl.cdiv(L, TL))

    # Scoped-VMEM request: double-buffered x + out blocks, g, plus headroom.
    block_pair = 2 * C * TL * itemsize
    needed = 2 * block_pair + 2 * C * 4 + (2 << 20)
    cap = (40 << 20) if vmem_capacity <= (64 << 20) else (64 << 20)
    vmem_limit = int(min(max(needed, 16 << 20), cap))

    cost = pl.CostEstimate(
        flops=4 * B * C * L,
        transcendentals=B * L,
        bytes_accessed=2 * B * C * L * itemsize + C * 4,
    )

    return pl.pallas_call(
        rmsnorm_kernel,
        out_shape=jax.ShapeDtypeStruct((B, C, L), x.dtype),
        grid_spec=pltpu.PrefetchScalarGridSpec(
            num_scalar_prefetch=0,
            grid=grid,
            in_specs=[
                pl.BlockSpec((pl.Squeezed(), C, TL), lambda b, l: (b, 0, l)),
                pl.BlockSpec((pl.Squeezed(), C, 1), lambda b, l: (0, 0, 0)),
            ],
            out_specs=pl.BlockSpec((pl.Squeezed(), C, TL), lambda b, l: (b, 0, l)),
        ),
        compiler_params=pltpu.CompilerParams(
            dimension_semantics=("parallel", "parallel"),
            vmem_limit_bytes=vmem_limit,
        ),
        cost_estimate=cost,
    )(x, g_scaled)


def rmsnorm_ref(x, g):
    # Pure-JAX reference mirroring F.normalize(x, dim=1) * g * sqrt(C)
    x32 = x.astype(jnp.float32)
    norm = jnp.sqrt(jnp.sum(x32 * x32, axis=1, keepdims=True))
    norm = jnp.maximum(norm, EPS)
    out = (x32 / norm) * g.astype(jnp.float32) * (x.shape[1] ** 0.5)
    return out.astype(x.dtype)


if __name__ == "__main__":
    key = jax.random.PRNGKey(0)

    B, C, L = 2, 32, 256
    x = jax.random.normal(key, (B, C, L), dtype=jnp.float32)
    # Deterministic parameter init: matches nn.Parameter(torch.ones(1, dim, 1))
    g = jnp.ones((1, C, 1), dtype=jnp.float32)

    out = jax.block_until_ready(rmsnorm(x, g))
    ref = rmsnorm_ref(x, g)
    assert out.shape == (B, C, L)
    assert jnp.allclose(out, ref, atol=1e-5, rtol=1e-5), "mismatch vs reference"

    # Partial last L tile (L not a multiple of the 128-lane tile).
    x2 = jax.random.normal(jax.random.PRNGKey(1), (B, C, 200), dtype=jnp.float32)
    out2 = jax.block_until_ready(rmsnorm(x2, g))
    assert jnp.allclose(out2, rmsnorm_ref(x2, g), atol=1e-5, rtol=1e-5), \
        "mismatch vs reference (partial tile)"

    # Tiny-L path (plain XLA fallback, no Pallas).
    x3 = jax.random.normal(jax.random.PRNGKey(2), (B, C, 16), dtype=jnp.float32)
    out3 = jax.block_until_ready(rmsnorm(x3, g))
    assert jnp.allclose(out3, rmsnorm_ref(x3, g), atol=1e-5, rtol=1e-5), \
        "mismatch vs reference (tiny L)"

    print("KERNEL_OK")
</pallas_src>

<mosaic_0001>
module attributes {stable_mosaic.version = 11 : i64} {
  func.func @rmsnorm_kernel(%arg0: i32, %arg1: i32, %arg2: memref<1x32x128xf32, #tpu.memory_space<vmem>>, %arg3: memref<1x32x1xf32, #tpu.memory_space<vmem>>, %arg4: memref<1x32x128xf32, #tpu.memory_space<vmem>>) attributes {dimension_semantics = [#tpu.dimension_semantics<parallel>, #tpu.dimension_semantics<parallel>], iteration_bounds = array<i64: 2, 2>, scalar_prefetch = 0 : i64, scratch_operands = 0 : i64, tpu.core_type = #tpu.core_type<tc>, window_params = [{transform_indices = @transform_0, window_bounds = array<i64: 1, 32, 128>}, {pipeline_mode = #tpu.pipeline_mode<synchronous>, transform_indices = @transform_1, window_bounds = array<i64: 1, 32, 1>}, {transform_indices = @transform_2, window_bounds = array<i64: 1, 32, 128>}]} {
    %c0 = arith.constant 0 : index
    %c0_0 = arith.constant 0 : index
    %c0_1 = arith.constant 0 : index
    %0 = vector.load %arg2[%c0, %c0_0, %c0_1] : memref<1x32x128xf32, #tpu.memory_space<vmem>>, vector<1x32x128xf32>
    %1 = vector.shape_cast %0 : vector<1x32x128xf32> to vector<32x128xf32>
    %c0_2 = arith.constant 0 : index
    %c0_3 = arith.constant 0 : index
    %c0_4 = arith.constant 0 : index
    %2 = vector.load %arg3[%c0_2, %c0_3, %c0_4] : memref<1x32x1xf32, #tpu.memory_space<vmem>>, vector<1x32x1xf32>
    %3 = vector.shape_cast %2 : vector<1x32x1xf32> to vector<32x1xf32>
    %4 = arith.mulf %1, %1 : vector<32x128xf32>
    %cst = arith.constant dense<0.000000e+00> : vector<128xf32>
    %5 = vector.multi_reduction <add>, %4, %cst [0] : vector<32x128xf32> to vector<128xf32>
    %6 = vector.shape_cast %5 : vector<128xf32> to vector<1x128xf32>
    %cst_5 = arith.constant 1.000000e-24 : f32
    %7 = vector.broadcast %cst_5 : f32 to vector<1x128xf32>
    %8 = arith.maximumf %6, %7 : vector<1x128xf32>
    %9 = math.rsqrt %8 : vector<1x128xf32>
    %10 = vector.broadcast %9 : vector<1x128xf32> to vector<32x128xf32>
    %11 = arith.mulf %1, %10 : vector<32x128xf32>
    %12 = vector.broadcast %3 : vector<32x1xf32> to vector<32x128xf32>
    %13 = arith.mulf %11, %12 : vector<32x128xf32>
    %c0_6 = arith.constant 0 : index
    %c0_7 = arith.constant 0 : index
    %c0_8 = arith.constant 0 : index
    %14 = vector.load %arg4[%c0_6, %c0_7, %c0_8] : memref<1x32x128xf32, #tpu.memory_space<vmem>>, vector<1x32x128xf32>
    %15 = vector.shape_cast %14 : vector<1x32x128xf32> to vector<32x128xf32>
    %16 = vector.shape_cast %13 : vector<32x128xf32> to vector<1x32x128xf32>
    tpu.vector_store %arg4[%c0_6, %c0_7, %c0_8], %16 {strides = array<i32>} : memref<1x32x128xf32, #tpu.memory_space<vmem>>, vector<1x32x128xf32>,
    return
  }
  func.func @transform_0(%arg0: i32, %arg1: i32) -> (i32, i32, i32) {
    %c0_i32 = arith.constant 0 : i32
    %c0_i32_0 = arith.constant 0 : i32
    return %arg0, %c0_i32, %arg1 : i32, i32, i32
  }
  func.func @transform_1(%arg0: i32, %arg1: i32) -> (i32, i32, i32) {
    %c0_i32 = arith.constant 0 : i32
    %c0_i32_0 = arith.constant 0 : i32
    %c0_i32_1 = arith.constant 0 : i32
    %c0_i32_2 = arith.constant 0 : i32
    return %c0_i32, %c0_i32_0, %c0_i32_1 : i32, i32, i32
  }
  func.func @transform_2(%arg0: i32, %arg1: i32) -> (i32, i32, i32) {
    %c0_i32 = arith.constant 0 : i32
    %c0_i32_0 = arith.constant 0 : i32
    return %arg0, %c0_i32, %arg1 : i32, i32, i32
  }
}

</mosaic_0001>

<bundles_post_ra>
// kernel: tpu_custom_call.1
= control target key start
LH: loop header
LB: loop body
LE: loop exit
PB: predicated region body
PF: predicated region fallthrough
CT: control target
= control target key end

     0   :  { %7 = vsyncpa [#allocation3], 0  ;;  %s806_s0 = inlined_call_operand.hbm [shape: f32[2,32,256], index: 0, kind: input, shape index: {}]   ;;  %s807_s1 = inlined_call_operand.vmem [shape: f32[1,32,1], index: 1, kind: input, shape index: {}]   ;;  %s808_s2 = inlined_call_operand.hbm [shape: f32[2,32,256], index: 2, kind: output, shape index: {}]  }
   0x1   :  { %9 = vsyncpa [#allocation3 + $0x1], 0 }
   0x2   :  { %10 = vsyncpa [#allocation4], 0 }
   0x3   :  { %12 = vsyncpa [#allocation4 + $0x1], 0  ;;  %s595_s9 = smov 0   ;;  %s597_s10 = smov 0  }
   0x4   :  { %s599_s11 = smov 0   ;;  %s601_s12 = smov 0  }
   0x5   :  { %s603_s13 = smov 0   ;;  %s605_s14 = smov 0  }
   0x6   :  { %s607_s15 = smov 0   ;;  %s609_s16 = smov 0  }
   0x7 LB: > { %s337_s17 = sadd.s32 4294967295, %s569_s16   ;;  %s338_s18 = sadd.s32 4294967294, %s569_s16   ;;  %s569_s16 = sphi %s609_s16, %s18_s16   ;;  %s565_s15 = sphi %s607_s15, %s823_s15   ;;  %s561_s14 = sphi %s605_s14, %s822_s14   ;;  %s557_s13 = sphi %s603_s13, %s821_s13   ;;  %s553_s12 = sphi %s601_s12, %s820_s12   ;;  %s549_s11 = sphi %s599_s11, %s819_s11   ;;  %s545_s10 = sphi %s597_s10, %s818_s10   ;;  %s541_s9 = sphi %s595_s9, %s817_s9  }
   0x8   : > { %s27_s19 = sadd.s32 1, %s561_s14  ;;  %s30_s20 = sadd.s32 1, %s565_s15 }
   0x9   : > { %p28_p0 = scmp.ge.s32.totalorder %s27_s19, 2  ;;  %s39_s21 = sadd.s32 1, %s549_s11 }
   0xa   : > { %p46_p1 = scmp.ne.s32.totalorder %s549_s11, %s545_s10  ;;  %p47_p2 = scmp.eq.s32.totalorder %s569_s16, 0 }
   0xb   : > { %s825_s19 = smov (%p28_p0, %s27_s19), 0  ;;  %s827_s20 = smov (!%p28_p0, %s30_s20), %s565_s15 }
   0xc   : > { %s35_s22 = ssub.s32 %s561_s14, %s825_s19  ;;  %p648_p3 = por %p47_p2, %p46_p1 }
   0xd   : > { %p32_p4 = scmp.ge.s32.totalorder %s827_s20, 2  ;;  %p52_p5 = scmp.ne.s32.totalorder %s545_s10, %s541_s9 }
   0xe   : > { %p53_p6 = scmp.eq.s32.totalorder %s337_s17, 0  ;;  %p99_p7 = scmp.eq.s32.totalorder %s337_s17, 3 }
   0xf   : > { %s829_s20 = smov (%p32_p4, %s827_s20), 0  ;;  %p105_p10 = scmp.eq.s32.totalorder %s338_s18, 3 }
  0x10   : > { %p656_p8 = por %p53_p6, %p52_p5  ;;  %p660_p9 = por %p99_p7, %p46_p1 }
  0x11   : > { %s34_s26 = ssub.s32 %s565_s15, %s829_s20  ;;  %p666_p12 = por %p105_p10, %p52_p5 }
  0x12   : > { %s812_s25 = scalar_select %p660_p9, 1, 0 }
  0x13   : > { %s36_s27 = sor.u32 %s35_s22, %s34_s26  ;;  %p364_p13 = scmp.lt.s32.totalorder %s569_s16, 4 }
  0x14   : > { %p37_p11 = scmp.eq.s32.totalorder %s36_s27, 0  ;;  %s128_s29 = sand.u32 1, %s549_s11  }
  0x15   : > { %s813_s28 = scalar_select %p666_p12, 1, 0 }
  0x16   : > { %s673_s30 = scalar_select %p37_p11, %s549_s11, %s39_s21  }
  0x17   : > { %s341_s3 = sshll.u32 %s128_s29, 5  ;;  %s342_s4 = sshll.u32 %s565_s15, 3 }
  0x18   : > { %s137_s5 = sadd.s32 %s561_s14, %s342_s4  ;;  %s132_s6 = scalar_lea.vmem [#allocation2], %s341_s3 }
  0x19   : > { %s140_s7 = sshll.u32 %s132_s6, 4  ;;  %s343_s8 = sshll.u32 %s137_s5, 7  ;;  %s677_s7 = int_to_ptr.vmem [resolvable:$true] %s140_s7 }
  0x1a   : > { %s682_s22 = scalar_lea.hbm %s806_s0, %s343_s8  ;;  %p686_p0 = pnand %p364_p13, %p648_p3 }
  0x1b   : > { %s690_s26 = scalar_lea.sflag [#allocation3], %s128_s29  ;;  %s441_s27 = scalar_lea.hbm %s682_s22, 512 }
  0x1c   : > { %p442_p1 = scmp.ne.s32.totalorder %s682_s22, %s441_s27  ;;  %p443_p2 = pneg %p686_p0 }
  0x1d   : > { %s446_s4 = scalar_lea.hbm %s806_s0, 2048  ;;  %p447_p3 = scmp.lt.u32.totalorder %s682_s22, %s806_s0 }
  0x1e   : > { %p444_p4 = pnand %p443_p2, %p442_p1  ;;  %p448_p6 = scmp.lt.u32.totalorder %s446_s4, %s441_s27 }
  0x1f   : > { %p450_p10 = scmp.lt.u32.totalorder %s441_s27, %s682_s22 }
  0x20   : > { %p445_p5 = pneg %p444_p4  ;;  %p449_p7 = por %p448_p6, %p447_p3 }
  0x22   : > { %p451_p11 = por %p450_p10, %p449_p7 }
  0x24   : > { %p452_p13 = pnand %p451_p11, %p445_p5 }
  0x26   : > { %455 = shalt.err (!%p452_p13)
}
  0x27   : > { %s456_s29 = scalar_lea.vmem %s677_s7, 512  ;;  %s571_s8 = smov [#allocation2]  }
  0x28   : > { %p457_p1 = scmp.ne.s32.totalorder %s677_s7, %s456_s29  ;;  %s461_s17 = sshll.u32 %s571_s8, 4  ;;  %s462_s17 = int_to_ptr.vmem [resolvable:$false] %s461_s17 }
  0x29   : > { %s463_s18 = scalar_lea.vmem %s462_s17, 1024  ;;  %p464_p9 = scmp.lt.s32.totalorder %s677_s7, %s462_s17 }
  0x2a   : > { %p459_p4 = pnand %p457_p1, %p443_p2  ;;  %p465_p3 = scmp.lt.s32.totalorder %s463_s18, %s456_s29 }
  0x2c   : > { %p460_p12 = pneg %p459_p4  ;;  %p466_p6 = por %p465_p3, %p464_p9 }
  0x2e   : > { %p467_p7 = pnand %p466_p6, %p460_p12 }
  0x30   : > { %470 = shalt.err (!%p467_p7)
}
  0x31   : > { %s572_s27 = smov 256   ;;  %s573_s23 = smov 128  }
  0x32   : > { %s574_s3 = smov 8   ;;  %p344_p2 = scmp.ge.s32.totalorder %s569_s16, 1 }
  0x33   : > { %359 = dma.hbm_to_vmem [thread:$0]  (!%p686_p0), %s682_s22, 512, %s677_s7, %s690_s26, %s572_s27, %s573_s23, %s574_s3  }
  0x34   : > { %p148_p5 = scmp.lt.s32.totalorder %s569_s16, 5 }
  0x36   : > { %p149_p10 = pnand %p344_p2, %p148_p5 }
  0x37   : > { %s721_s4 = sand.u32 (!%p149_p10), 1, %s545_s10  }
  0x38   : > { %152 = sbr.rel (%p149_p10) target bundleno = 216 (0xd8), region = 28  ;;  %s345_s5 = sshll.u32 (!%p149_p10), %s721_s4, 5 }
  0x39   : > { %s155_s6 = scalar_lea.sflag (!%p149_p10), [#allocation3], %s721_s4  ;;  %s158_s29 = scalar_lea.vmem (!%p149_p10), [#allocation2], %s345_s5 }
  0x3f   : > { %532 = dma.done.wait (%p656_p8), %s155_s6, 512  }
  0x40   : > { %534 = vsyncadd (%p656_p8), %s155_s6, 4294966784  ;;  %v575_v0 = vmov 0   ;;  %v185_v1 = vld [vmem:[%s807_s1 + $0x10] sm:$0xff]  ;;  %v183_v2 = vld [vmem:[%s807_s1] sm:$0xff]  ;;  %s348_s27 = sshll.u32 %s557_s13, 3  ;;  %s178_s3 = scalar_lea.vmem [#allocation5], %s345_s5 }
  0x41   : > { %438 = vset.pattern.permute.xlu1 %v575_v0  ;;  %437 = vset.pattern.permute.xlu0 %v575_v0  ;;  %v186_v3 = vld [vmem:[%s807_s1 + $0x18] sm:$0xff]  ;;  %v184_v4 = vld [vmem:[%s807_s1 + $0x8] sm:$0xff]  ;;  %v179_v5 = vld [vmem:[%s158_s29] sm:$0xff]  ;;  %s246_s23 = sadd.s32 %s553_s12, %s348_s27  ;;  %s249_s6 = sshll.u32 %s178_s3, 4  ;;  %s747_s6 = int_to_ptr.vmem [resolvable:$true] %s249_s6 }
  0x42   : > { %218 = vperm.xlu1 %438, %v185_v1   ;;  %208 = vperm.xlu0 %437, %v183_v2   ;;  %v180_v6 = vld [vmem:[%s158_s29 + $0x8] sm:$0xff]  ;;  %v187_v7 = vmul.f32 %v179_v5, %v179_v5  ;;  %v181_v9 = vld [vmem:[%s158_s29 + $0x10] sm:$0xff]  ;;  %v182_v12 = vld [vmem:[%s158_s29 + $0x18] sm:$0xff]  ;;  %s349_s29 = sshll.u32 %s246_s23, 7  ;;  %s235_s7 = scalar_lea.sflag [#allocation4], %s721_s4 }
  0x43   : > { %v188_v8 = vmul.f32 %v180_v6, %v180_v6  ;;  %v189_v10 = vmul.f32 %v181_v9, %v181_v9  ;;  %v190_v13 = vmul.f32 %v182_v12, %v182_v12  ;;  %s752_s5 = scalar_lea.hbm %s808_s2, %s349_s29  ;;  %s471_s22 = scalar_lea.vmem %s747_s6, 512 }
  0x44   : > { %p472_p8 = scmp.ne.s32.totalorder %s747_s6, %s471_s22  ;;  %p815_p9 = scmp.ne.s32.totalorder %s812_s25, 0 }
  0x45   : > { %v191_v11 = vadd.f32 %v188_v8, %v187_v7  ;;  %s576_s21 = smov [#allocation5]  }
  0x46   : > { %223 = vperm.xlu1 %438, %v186_v3   ;;  %213 = vperm.xlu0 %437, %v184_v4   ;;  %p473_p12 = pnand %p472_p8, %p815_p9  ;;  %s475_s26 = sshll.u32 %s576_s21, 4  ;;  %s476_s26 = int_to_ptr.vmem [resolvable:$false] %s475_s26 }
  0x47   : > { %v192_v14 = vadd.f32 %v191_v11, %v189_v10  ;;  %s477_s8 = scalar_lea.vmem %s476_s26, 1024  ;;  %p478_p11 = scmp.lt.s32.totalorder %s747_s6, %s476_s26 }
  0x48   : > { %p474_p0 = pneg %p473_p12  ;;  %p479_p13 = scmp.lt.s32.totalorder %s477_s8, %s471_s22 }
  0x49   : > { %v193_v15 = vadd.f32 %v192_v14, %v190_v13 }
  0x4a   : > { %p480_p1 = por %p479_p13, %p478_p11 }
  0x4b   : > { %v194_v16 = vrot.slane %v193_v15, 4 }
  0x4c   : > { %p481_p4 = pnand %p480_p1, %p474_p0 }
  0x4d   : > { %v195_v17 = vadd.f32 %v194_v16, %v193_v15 }
  0x4f   : > { %v196_v18 = vrot.slane %v195_v17, 2 }
  0x51   : > { %v197_v19 = vadd.f32 %v196_v18, %v195_v17 }
  0x53   : > { %v198_v20 = vrot.slane %v197_v19, 1 }
  0x55   : > { %v199_v21 = vadd.f32 %v198_v20, %v197_v19 }
  0x57   : > { %v200_v22 = vmax.f32 %v199_v21, 1e-24 }
  0x59   : > { %439 = vrsqrt.f32 %v200_v22 }
  0x63   : > { %v440_v23 = vpop.eup %439 }
  0x64   : > { %v204_v24 = vmul.f32 %v440_v23, %v181_v9  ;;  %v202_v25 = vmul.f32 %v440_v23, %v179_v5  ;;  %v205_v30 = vmul.f32 %v440_v23, %v182_v12  ;;  %v203_v31 = vmul.f32 %v440_v23, %v180_v6 }
  0xc1   : > { %v219_v26 = vpop.permute.xlu1 %218  ;;  %v209_v27 = vpop.permute.xlu0 %208 }
  0xc2   : > { %v228_v28 = vmul.f32 %v219_v26, %v204_v24  ;;  %v226_v29 = vmul.f32 %v209_v27, %v202_v25 }
  0xc4   : > { %232 = vst [vmem:[%s178_s3 + $0x10] sm:$0xff] %v228_v28  ;;  %230 = vst [vmem:[%s178_s3] sm:$0xff] %v226_v29 }
  0xc5   : > { %v224_v32 = vpop.permute.xlu1 %223  ;;  %v214_v33 = vpop.permute.xlu0 %213 }
  0xc6   : > { %v229_v34 = vmul.f32 %v224_v32, %v205_v30  ;;  %v227_v35 = vmul.f32 %v214_v33, %v203_v31 }
  0xc8   : > { %233 = vst [vmem:[%s178_s3 + $0x18] sm:$0xff] %v229_v34  ;;  %231 = vst [vmem:[%s178_s3 + $0x8] sm:$0xff] %v227_v35 }
  0xc9   : > { %484 = shalt.err (!%p481_p4)
}
  0xca   : > { %s485_s17 = scalar_lea.hbm %s752_s5, 512  ;;  %s489_s27 = scalar_lea.hbm %s808_s2, 2048 }
  0xcb   : > { %p486_p3 = scmp.ne.s32.totalorder %s752_s5, %s485_s17  ;;  %p490_p2 = scmp.lt.u32.totalorder %s752_s5, %s808_s2 }
  0xcc   : > { %p491_p5 = scmp.lt.u32.totalorder %s489_s27, %s485_s17  ;;  %p493_p8 = scmp.lt.u32.totalorder %s485_s17, %s752_s5 }
  0xcd   : > { %p487_p6 = pnand %p486_p3, %p815_p9 }
  0xce   : > { %p492_p10 = por %p491_p5, %p490_p2 }
  0xcf   : > { %p488_p7 = pneg %p487_p6 }
  0xd0   : > { %p494_p12 = por %p493_p8, %p492_p10 }
  0xd2   : > { %p495_p0 = pnand %p494_p12, %p488_p7 }
  0xd4   : > { %498 = shalt.err (!%p495_p0)
}
  0xd5   : > { %s577_s29 = smov 128   ;;  %s578_s12 = smov 256  }
  0xd6   : > { %s579_s13 = smov 8  }
  0xd7   : > { %354 = dma.vmem_to_hbm [thread:$0]  (%p815_p9), %s747_s6, 512, %s752_s5, %s235_s7, %s577_s29, %s578_s12, %s579_s13  }
  0xd8 PF: > { %p365_p11 = scmp.ge.s32.totalorder %s569_s16, 2  ;;  %s264_s22 = sand.u32 1, %s541_s9  }
  0xd9   : > { %p816_p13 = scmp.ne.s32.totalorder %s813_s28, 0  ;;  %s265_s21 = scalar_lea.sflag [#allocation4], %s264_s22 }
  0xdb   : > { %p361_p1 = pnand %p365_p11, %p816_p13 }
  0xdd   : > { %536 = dma.done.wait (!%p361_p1), %s265_s21, 512  }
  0xde   : > { %538 = vsyncadd (!%p361_p1), %s265_s21, 4294966784  ;;  %s18_s16 = sadd.s32 1, %s569_s16   ;;  %s817_s9 = smov %s545_s10 }
  0xdf   : > { %p15_p4 = scmp.ge.s32.totalorder %s18_s16, 6   ;;  %s818_s10 = smov %s549_s11 }
  0xe0   : > { %s819_s11 = smov %s673_s30  ;;  %s820_s12 = smov %s561_s14 }
  0xe1   : > { %s821_s13 = smov %s565_s15  ;;  %s822_s14 = smov %s825_s19 }
  0xe2   : > { %s823_s15 = smov %s829_s20  ;;  %17 = sbr.rel (!%p15_p4) target bundleno = 7 (0x7), region = 73 }
  0xe9   :  { %270 = vsyncpa [#allocation3], 1 }
  0xea   :  { %272 = vsyncpa [#allocation3 + $0x1], 1 }
  0xeb   :  { %273 = vsyncpa [#allocation4], 1 }
  0xec   :  { %275 = vsyncpa [#allocation4 + $0x1], 1 }

</bundles_post_ra>
